<compile_context>
chip_gen: v7x
topology: tpu7x:2x2x1
jax: 0.10.0
libtpu: 0.0.40
codegen_flags: <defaults>
</compile_context>

<pallas_src>
import functools

import jax
import jax.numpy as jnp
from jax.experimental import pallas as pl
from jax.experimental.pallas import tpu as pltpu

NUM_BLOCKS = 12                 # 12 DummyBlocks, each doing x + 1
LANE_CHOICES = (512, 256, 128)  # lane-dense last dims (multiples of 128)
TM_MAX = 1024                   # rows per block: (1024, 512) f32 = 2 MiB
TINY_BYTES = 1 << 20            # below this a fused XLA add beats a custom call


def dummy_model_kernel(x_ref, o_ref):
    # 12 sequential (+1) blocks folded into a single add.
    o_ref[...] = x_ref[...] + NUM_BLOCKS


def _round_up(a, m):
    return -(-a // m) * m


@functools.partial(jax.jit, static_argnames=("force_pallas",))
def dummy_model_forward(x, force_pallas=False):
    """x: NCHW tensor. Returns x after 12 (+1) blocks (== x + 12)."""
    orig_shape = x.shape
    n = x.size

    # Lane width that divides n exactly -> no pad/slice HBM round trip.
    lanes = next((l for l in LANE_CHOICES if n % l == 0), None)

    tiny = (n * x.dtype.itemsize < TINY_BYTES) and not force_pallas
    if lanes is None or tiny:
        # Ragged total size or tiny input: XLA's fused elementwise add is
        # already HBM-roofline optimal and avoids pallas_call launch overhead.
        return x + jnp.asarray(NUM_BLOCKS, dtype=x.dtype)

    rows = n // lanes
    x2d = x.reshape(rows, lanes)

    if rows < 16:
        # Single block equal to the full row extent (8-divisibility exempt).
        tm = rows
    elif rows <= 2 * TM_MAX:
        # Split into >= 2 grid steps so both v7x TensorCores participate.
        tm = min(TM_MAX, _round_up(-(-rows // 2), 8))
    else:
        tm = TM_MAX
    grid = (pl.cdiv(rows, tm),)

    out2d = pl.pallas_call(
        dummy_model_kernel,
        out_shape=jax.ShapeDtypeStruct(x2d.shape, x2d.dtype),
        grid_spec=pl.GridSpec(
            grid=grid,
            in_specs=[pl.BlockSpec((tm, lanes), lambda i: (i, 0))],
            out_specs=pl.BlockSpec((tm, lanes), lambda i: (i, 0)),
        ),
        compiler_params=pltpu.CompilerParams(
            dimension_semantics=("parallel",),
        ),
    )(x2d)

    return out2d.reshape(orig_shape)


if __name__ == "__main__":
    key = jax.random.PRNGKey(0)

    # Small NCHW input consistent with a patch_size-16 model: (B, C, H, W).
    x = jax.random.normal(key, (2, 4, 16, 16), dtype=jnp.float32)
    out = jax.block_until_ready(dummy_model_forward(x, force_pallas=True))
    ref = x + float(NUM_BLOCKS)
    assert out.shape == x.shape and out.dtype == x.dtype
    assert jnp.allclose(out, ref, atol=1e-6), "mismatch vs reference (small)"

    # Slightly larger input to exercise the 2-block ("parallel") path.
    x2 = jax.random.normal(jax.random.PRNGKey(1), (2, 4, 64, 64),
                           dtype=jnp.float32)
    out2 = jax.block_until_ready(dummy_model_forward(x2, force_pallas=True))
    assert jnp.allclose(out2, x2 + float(NUM_BLOCKS), atol=1e-6), \
        "mismatch vs reference (multi-block)"

    # Default path (tiny-input short-circuit to fused XLA add) also correct.
    out3 = jax.block_until_ready(dummy_model_forward(x))
    assert jnp.allclose(out3, ref, atol=1e-6), "mismatch vs reference (xla)"

    print("KERNEL_OK")
</pallas_src>

<mosaic_0001>
module attributes {stable_mosaic.version = 11 : i64} {
  func.func @dummy_model_kernel(%arg0: i32, %arg1: memref<4x512xf32, #tpu.memory_space<vmem>>, %arg2: memref<4x512xf32, #tpu.memory_space<vmem>>) attributes {dimension_semantics = [#tpu.dimension_semantics<parallel>], iteration_bounds = array<i64: 1>, scalar_prefetch = 0 : i64, scratch_operands = 0 : i64, tpu.core_type = #tpu.core_type<tc>, window_params = [{transform_indices = @transform_0, window_bounds = array<i64: 4, 512>}, {transform_indices = @transform_1, window_bounds = array<i64: 4, 512>}]} {
    %c0 = arith.constant 0 : index
    %c0_0 = arith.constant 0 : index
    %0 = vector.load %arg1[%c0, %c0_0] : memref<4x512xf32, #tpu.memory_space<vmem>>, vector<4x512xf32>
    %cst = arith.constant 1.200000e+01 : f32
    %1 = vector.broadcast %cst : f32 to vector<4x512xf32>
    %2 = arith.addf %0, %1 : vector<4x512xf32>
    %c0_1 = arith.constant 0 : index
    %c0_2 = arith.constant 0 : index
    %3 = vector.load %arg2[%c0_1, %c0_2] : memref<4x512xf32, #tpu.memory_space<vmem>>, vector<4x512xf32>
    tpu.vector_store %arg2[%c0_1, %c0_2], %2 {strides = array<i32>} : memref<4x512xf32, #tpu.memory_space<vmem>>, vector<4x512xf32>,
    return
  }
  func.func @transform_0(%arg0: i32) -> (i32, i32) {
    %c0_i32 = arith.constant 0 : i32
    %c0_i32_0 = arith.constant 0 : i32
    return %arg0, %c0_i32 : i32, i32
  }
  func.func @transform_1(%arg0: i32) -> (i32, i32) {
    %c0_i32 = arith.constant 0 : i32
    %c0_i32_0 = arith.constant 0 : i32
    return %arg0, %c0_i32 : i32, i32
  }
}

</mosaic_0001>

<bundles_post_ra>
// kernel: dummy_model_forward.1
= control target key start
LH: loop header
LB: loop body
LE: loop exit
PB: predicated region body
PF: predicated region fallthrough
CT: control target
= control target key end

     0   :  { %s40_s0 = inlined_call_operand.vmem [shape: f32[4,512], index: 0, kind: input, shape index: {}]   ;;  %s41_s1 = inlined_call_operand.vmem [shape: f32[4,512], index: 1, kind: output, shape index: {}]  }
   0x1   :  { %v8_v0 = vld [vmem:[%s40_s0] sm:$0xff]  ;;  %v9_v1 = vld [vmem:[%s40_s0 + $0x8] sm:$0xff] }
   0x2   :  { %v10_v2 = vadd.f32 12.0, %v8_v0  ;;  %v11_v3 = vadd.f32 12.0, %v9_v1 }
   0x4   :  { %12 = vst [vmem:[%s41_s1] sm:$0xff] %v10_v2  ;;  %13 = vst [vmem:[%s41_s1 + $0x8] sm:$0xff] %v11_v3 }

</bundles_post_ra>
